<compile_context>
chip_gen: v7x
topology: tpu7x:2x2x1
jax: 0.10.0
libtpu: 0.0.40
codegen_flags: <defaults>
</compile_context>

<pallas_src>
import functools

import jax
import jax.numpy as jnp
from jax.experimental import pallas as pl
from jax.experimental.pallas import tpu as pltpu


def _cdiv(a, b):
    return -(-a // b)


def _round_up(x, m):
    return ((x + m - 1) // m) * m


def _physical_vmem_bytes():
    """Best-effort physical VMEM per TensorCore; conservative fallback (v7x)."""
    try:
        info = pltpu.get_tpu_info()
        for name in ("vmem_capacity_bytes", "vmem_size_bytes", "vmem_bytes"):
            v = getattr(info, name, None)
            if v:
                return int(v)
    except Exception:
        pass
    return 64 << 20


def _highway_layer_math(x, w, b, hidden, mxu_dtype):
    """One fused highway layer: (T,H) @ (H,2H) GEMM, then gate/blend in f32."""
    lin = jax.lax.dot_general(
        x.astype(mxu_dtype), w,
        (((1,), (0,)), ((), ())),
        preferred_element_type=jnp.float32)
    lin = lin + b.astype(jnp.float32)
    g_lin = lin[:, :hidden]
    t_lin = lin[:, hidden:]
    # sigmoid(z) == 0.5*(tanh(z/2)+1): single EUP op, numerically safe.
    g = 0.5 * (jnp.tanh(0.5 * g_lin) + 1.0)
    t = jnp.maximum(t_lin, 0.0)                     # relu
    return x + g * (t - x)                          # == g*t + (1-g)*x


def _highway_resident_kernel(x_ref, w_ref, b_ref, o_ref, *,
                             num_layers, hidden, mxu_dtype):
    """Whole highway stack for one batch tile; packed weights VMEM-resident.

    x_ref : (TILE_B, H)   activation tile (streamed per grid step)
    w_ref : (L, H, 2H)    packed [gate | transform] weights, (in, out) layout
    b_ref : (L, 1, 2H)    packed biases, f32
    o_ref : (TILE_B, H)
    """
    x = x_ref[...].astype(jnp.float32)
    for layer in range(num_layers):                 # small L -> static unroll
        x = _highway_layer_math(x, w_ref[layer], b_ref[layer], hidden, mxu_dtype)
    o_ref[...] = x.astype(o_ref.dtype)


def _highway_stream_kernel(x_ref, w_ref, b_ref, o_ref, acc_ref, *,
                           hidden, mxu_dtype):
    """One highway layer per grid step (layer axis = 'arbitrary').

    The activation is carried across layer steps in a VMEM scratch so only one
    (H, 2H) weight slab needs to be VMEM-resident at a time (v7x-friendly).
    """
    layer = pl.program_id(1)

    @pl.when(layer == 0)
    def _():
        acc_ref[...] = x_ref[...].astype(jnp.float32)

    x = _highway_layer_math(acc_ref[...], w_ref[0], b_ref[0], hidden, mxu_dtype)
    acc_ref[...] = x

    @pl.when(layer == pl.num_programs(1) - 1)
    def _():
        o_ref[...] = x.astype(o_ref.dtype)


def highway_pallas(x, wg, bg, wt, bt, *, tile_b=None, mxu_dtype=jnp.bfloat16,
                   io_dtype=None, stream_layers=None):
    """Highway forward.

    x      : (B, H)
    wg, wt : (L, H, H)  PyTorch (out, in) layout (gate / transform weights)
    bg, bt : (L, H)
    io_dtype: optionally stream x/out in a narrower dtype (e.g. bf16) when the
              surrounding model tolerates it (kernel is HBM-bound for small H*L).
    stream_layers: None = auto (stream per-layer weights when they would not
              comfortably fit VMEM-resident, e.g. large L*H on v7x).
    """
    B, H = x.shape
    L = wg.shape[0]
    io_dtype = x.dtype if io_dtype is None else jnp.dtype(io_dtype)

    # Pack gate/transform into one (in, out) weight per layer: (L, H, 2H).
    w_packed = jnp.concatenate(
        [jnp.swapaxes(wg, 1, 2), jnp.swapaxes(wt, 1, 2)], axis=-1).astype(mxu_dtype)
    # Packed biases kept f32, shaped (L, 1, 2H) for a clean 2-D broadcast.
    b_packed = jnp.concatenate([bg, bt], axis=-1).astype(jnp.float32)[:, None, :]

    # ---- VMEM budget ---------------------------------------------------------
    phys = _physical_vmem_bytes()
    # Leave headroom for Mosaic internal scratch: ~48 MiB on v7x, ~100 MiB v5e/v6e.
    cap = max(min(phys - (16 << 20), 100 << 20), 24 << 20)

    w_itemsize = jnp.dtype(mxu_dtype).itemsize
    io_itemsize = jnp.dtype(io_dtype).itemsize
    resident_w_bytes = L * H * 2 * H * w_itemsize + L * 2 * H * 4  # Buffered(1): x1

    if stream_layers is None:
        stream_layers = resident_w_bytes > int(0.4 * cap)

    def est_bytes(tb):
        if stream_layers:
            w = 2 * (H * 2 * H * w_itemsize + 2 * H * 4)   # double-buffered layer slab
            scratch = tb * H * 4                           # carried activation
        else:
            w = resident_w_bytes
            scratch = 0
        io = 2 * 2 * tb * H * io_itemsize                  # in + out, double-buffered
        act = 10 * tb * H * 4                              # x, lin(2H), g, t, blend (f32)
        return w + io + act + scratch

    # ---- Batch tiling --------------------------------------------------------
    if tile_b is None:
        tile_b = 8
        for cand in (1024, 512, 256, 128, 64, 32, 16, 8):
            if est_bytes(cand) <= int(0.8 * cap):
                tile_b = cand
                break
    if tile_b >= B:
        if B >= 256:
            # Keep >=2 grid steps so the "parallel" axis can feed both v7x cores.
            tile_b = _round_up(_cdiv(B, 2), 8)
        else:
            tile_b = B                          # single full-dim tile (no 8-constraint)
    else:
        tile_b = _round_up(tile_b, 8)           # (8,128) block constraint

    n_tiles = _cdiv(B, tile_b)
    b_pad = n_tiles * tile_b
    xp = x.astype(io_dtype)
    if b_pad != B:
        xp = jnp.pad(xp, ((0, b_pad - B), (0, 0)))

    vmem_limit = int(min(max(1.25 * est_bytes(tile_b), 32 << 20), cap))

    # ---- Specs / kernel ------------------------------------------------------
    if stream_layers:
        kernel = functools.partial(_highway_stream_kernel,
                                   hidden=H, mxu_dtype=mxu_dtype)
        grid = (n_tiles, L)
        in_specs = [
            pl.BlockSpec((tile_b, H), lambda i, l: (i, 0)),       # x (fetched once per i)
            pl.BlockSpec((1, H, 2 * H), lambda i, l: (l, 0, 0)),  # per-layer weights
            pl.BlockSpec((1, 1, 2 * H), lambda i, l: (l, 0, 0)),  # per-layer biases
        ]
        out_specs = pl.BlockSpec((tile_b, H), lambda i, l: (i, 0))
        scratch_shapes = [pltpu.VMEM((tile_b, H), jnp.float32)]
        dim_sem = ("parallel", "arbitrary")
    else:
        kernel = functools.partial(_highway_resident_kernel,
                                   num_layers=L, hidden=H, mxu_dtype=mxu_dtype)
        grid = (n_tiles,)
        in_specs = [
            pl.BlockSpec((tile_b, H), lambda i: (i, 0)),           # streamed x tile
            pl.BlockSpec((L, H, 2 * H), lambda i: (0, 0, 0),       # resident weights
                         pipeline_mode=pl.Buffered(1)),
            pl.BlockSpec((L, 1, 2 * H), lambda i: (0, 0, 0),       # resident biases
                         pipeline_mode=pl.Buffered(1)),
        ]
        out_specs = pl.BlockSpec((tile_b, H), lambda i: (i, 0))
        scratch_shapes = []
        dim_sem = ("parallel",)

    out = pl.pallas_call(
        kernel,
        out_shape=jax.ShapeDtypeStruct((b_pad, H), io_dtype),
        grid=grid,
        in_specs=in_specs,
        out_specs=out_specs,
        scratch_shapes=scratch_shapes,
        compiler_params=pltpu.CompilerParams(
            dimension_semantics=dim_sem,
            vmem_limit_bytes=vmem_limit,
        ),
    )(xp, w_packed, b_packed)
    return out[:B] if b_pad != B else out


def highway_reference(x, wg, bg, wt, bt):
    """Pure-JAX f32 reference mirroring the PyTorch forward."""
    xf = x.astype(jnp.float32)
    for layer in range(wg.shape[0]):
        g = jax.nn.sigmoid(xf @ wg[layer].T + bg[layer])
        t = jax.nn.relu(xf @ wt[layer].T + bt[layer])
        xf = g * t + (1.0 - g) * xf
    return xf.astype(x.dtype)


if __name__ == "__main__":
    num_layers = 3
    batch = 64
    hidden = 128

    key = jax.random.PRNGKey(0)
    kx, kwg, kbg, kwt, kbt = jax.random.split(key, 5)

    x = jax.random.normal(kx, (batch, hidden), dtype=jnp.float32)
    scale = 1.0 / jnp.sqrt(hidden)
    wg = jax.random.uniform(kwg, (num_layers, hidden, hidden),
                            minval=-scale, maxval=scale, dtype=jnp.float32)
    bg = jax.random.uniform(kbg, (num_layers, hidden),
                            minval=-scale, maxval=scale, dtype=jnp.float32)
    wt = jax.random.uniform(kwt, (num_layers, hidden, hidden),
                            minval=-scale, maxval=scale, dtype=jnp.float32)
    bt = jax.random.uniform(kbt, (num_layers, hidden),
                            minval=-scale, maxval=scale, dtype=jnp.float32)

    ref = highway_reference(x, wg, bg, wt, bt)

    # Path 1: resident packed weights (default for small L*H).
    out = jax.block_until_ready(highway_pallas(x, wg, bg, wt, bt))
    assert out.shape == (batch, hidden)
    # bf16 MXU inputs vs the f32 reference -> relaxed tolerance (documented).
    assert jnp.allclose(out, ref, atol=5e-2, rtol=5e-2), "resident path mismatch"

    # Path 2: per-layer streamed weights with an "arbitrary" layer grid axis
    # (the path auto-selected on v7x for large L*H); force it so it is exercised.
    out_s = jax.block_until_ready(
        highway_pallas(x, wg, bg, wt, bt, tile_b=32, stream_layers=True))
    assert out_s.shape == (batch, hidden)
    assert jnp.allclose(out_s, ref, atol=5e-2, rtol=5e-2), "streaming path mismatch"

    # TODO(synk): io_dtype=jnp.bfloat16 halves streamed HBM bytes when the
    # surrounding model tolerates bf16 activations (kernel is HBM-bound for
    # small H*L); left off by default to preserve the module's f32 output dtype.

    print("KERNEL_OK")
</pallas_src>

<mosaic_0001>
module attributes {stable_mosaic.version = 11 : i64} {
  func.func @_highway_resident_kernel(%arg0: i32, %arg1: memref<64x128xf32, #tpu.memory_space<vmem>>, %arg2: memref<3x128x256xbf16, #tpu.memory_space<vmem>>, %arg3: memref<3x1x256xf32, #tpu.memory_space<vmem>>, %arg4: memref<64x128xf32, #tpu.memory_space<vmem>>) attributes {dimension_semantics = [#tpu.dimension_semantics<parallel>], iteration_bounds = array<i64: 1>, scalar_prefetch = 0 : i64, scratch_operands = 0 : i64, tpu.core_type = #tpu.core_type<tc>, window_params = [{transform_indices = @transform_0, window_bounds = array<i64: 64, 128>}, {pipeline_mode = #tpu.pipeline_mode<synchronous>, transform_indices = @transform_1, window_bounds = array<i64: 3, 128, 256>}, {pipeline_mode = #tpu.pipeline_mode<synchronous>, transform_indices = @transform_2, window_bounds = array<i64: 3, 1, 256>}, {transform_indices = @transform_3, window_bounds = array<i64: 64, 128>}]} {
    %c0 = arith.constant 0 : index
    %c0_0 = arith.constant 0 : index
    %0 = vector.load %arg1[%c0, %c0_0] : memref<64x128xf32, #tpu.memory_space<vmem>>, vector<64x128xf32>
    %c0_1 = arith.constant 0 : index
    %c0_2 = arith.constant 0 : index
    %c0_3 = arith.constant 0 : index
    %1 = vector.load %arg2[%c0_1, %c0_2, %c0_3] : memref<3x128x256xbf16, #tpu.memory_space<vmem>>, vector<1x128x256xbf16>
    %2 = vector.shape_cast %1 : vector<1x128x256xbf16> to vector<128x256xbf16>
    %c0_4 = arith.constant 0 : index
    %c0_5 = arith.constant 0 : index
    %c0_6 = arith.constant 0 : index
    %3 = vector.load %arg3[%c0_4, %c0_5, %c0_6] : memref<3x1x256xf32, #tpu.memory_space<vmem>>, vector<1x1x256xf32>
    %4 = vector.shape_cast %3 : vector<1x1x256xf32> to vector<1x256xf32>
    %5 = arith.truncf %0 : vector<64x128xf32> to vector<64x128xbf16>
    %cst = arith.constant dense<0.000000e+00> : vector<64x256xf32>
    %6 = tpu.matmul %5, %2, %cst {dimension_numbers = #tpu.dot_dimension_numbers<[1], [0], [0], [1], [0, 0, 1, 1], [], []>} : vector<64x128xbf16>, vector<128x256xbf16>, vector<64x256xf32> -> vector<64x256xf32>
    %7 = vector.broadcast %4 : vector<1x256xf32> to vector<64x256xf32>
    %8 = arith.addf %6, %7 : vector<64x256xf32>
    %9 = vector.extract_strided_slice %8 {offsets = [0, 0], sizes = [64, 128], strides = [1, 1]} : vector<64x256xf32> to vector<64x128xf32>
    %10 = vector.extract_strided_slice %8 {offsets = [0, 128], sizes = [64, 128], strides = [1, 1]} : vector<64x256xf32> to vector<64x128xf32>
    %cst_7 = arith.constant 5.000000e-01 : f32
    %11 = vector.broadcast %cst_7 : f32 to vector<64x128xf32>
    %12 = arith.mulf %11, %9 : vector<64x128xf32>
    %13 = math.tanh %12 : vector<64x128xf32>
    %cst_8 = arith.constant 1.000000e+00 : f32
    %14 = vector.broadcast %cst_8 : f32 to vector<64x128xf32>
    %15 = arith.addf %13, %14 : vector<64x128xf32>
    %cst_9 = arith.constant 5.000000e-01 : f32
    %16 = vector.broadcast %cst_9 : f32 to vector<64x128xf32>
    %17 = arith.mulf %16, %15 : vector<64x128xf32>
    %cst_10 = arith.constant 0.000000e+00 : f32
    %18 = vector.broadcast %cst_10 : f32 to vector<64x128xf32>
    %19 = arith.maximumf %10, %18 : vector<64x128xf32>
    %20 = arith.subf %19, %0 : vector<64x128xf32>
    %21 = arith.mulf %17, %20 : vector<64x128xf32>
    %22 = arith.addf %0, %21 : vector<64x128xf32>
    %c1 = arith.constant 1 : index
    %c0_11 = arith.constant 0 : index
    %c0_12 = arith.constant 0 : index
    %23 = vector.load %arg2[%c1, %c0_11, %c0_12] : memref<3x128x256xbf16, #tpu.memory_space<vmem>>, vector<1x128x256xbf16>
    %24 = vector.shape_cast %23 : vector<1x128x256xbf16> to vector<128x256xbf16>
    %c1_13 = arith.constant 1 : index
    %c0_14 = arith.constant 0 : index
    %c0_15 = arith.constant 0 : index
    %25 = vector.load %arg3[%c1_13, %c0_14, %c0_15] : memref<3x1x256xf32, #tpu.memory_space<vmem>>, vector<1x1x256xf32>
    %26 = vector.shape_cast %25 : vector<1x1x256xf32> to vector<1x256xf32>
    %27 = arith.truncf %22 : vector<64x128xf32> to vector<64x128xbf16>
    %cst_16 = arith.constant dense<0.000000e+00> : vector<64x256xf32>
    %28 = tpu.matmul %27, %24, %cst_16 {dimension_numbers = #tpu.dot_dimension_numbers<[1], [0], [0], [1], [0, 0, 1, 1], [], []>} : vector<64x128xbf16>, vector<128x256xbf16>, vector<64x256xf32> -> vector<64x256xf32>
    %29 = vector.broadcast %26 : vector<1x256xf32> to vector<64x256xf32>
    %30 = arith.addf %28, %29 : vector<64x256xf32>
    %31 = vector.extract_strided_slice %30 {offsets = [0, 0], sizes = [64, 128], strides = [1, 1]} : vector<64x256xf32> to vector<64x128xf32>
    %32 = vector.extract_strided_slice %30 {offsets = [0, 128], sizes = [64, 128], strides = [1, 1]} : vector<64x256xf32> to vector<64x128xf32>
    %cst_17 = arith.constant 5.000000e-01 : f32
    %33 = vector.broadcast %cst_17 : f32 to vector<64x128xf32>
    %34 = arith.mulf %33, %31 : vector<64x128xf32>
    %35 = math.tanh %34 : vector<64x128xf32>
    %cst_18 = arith.constant 1.000000e+00 : f32
    %36 = vector.broadcast %cst_18 : f32 to vector<64x128xf32>
    %37 = arith.addf %35, %36 : vector<64x128xf32>
    %cst_19 = arith.constant 5.000000e-01 : f32
    %38 = vector.broadcast %cst_19 : f32 to vector<64x128xf32>
    %39 = arith.mulf %38, %37 : vector<64x128xf32>
    %cst_20 = arith.constant 0.000000e+00 : f32
    %40 = vector.broadcast %cst_20 : f32 to vector<64x128xf32>
    %41 = arith.maximumf %32, %40 : vector<64x128xf32>
    %42 = arith.subf %41, %22 : vector<64x128xf32>
    %43 = arith.mulf %39, %42 : vector<64x128xf32>
    %44 = arith.addf %22, %43 : vector<64x128xf32>
    %c2 = arith.constant 2 : index
    %c0_21 = arith.constant 0 : index
    %c0_22 = arith.constant 0 : index
    %45 = vector.load %arg2[%c2, %c0_21, %c0_22] : memref<3x128x256xbf16, #tpu.memory_space<vmem>>, vector<1x128x256xbf16>
    %46 = vector.shape_cast %45 : vector<1x128x256xbf16> to vector<128x256xbf16>
    %c2_23 = arith.constant 2 : index
    %c0_24 = arith.constant 0 : index
    %c0_25 = arith.constant 0 : index
    %47 = vector.load %arg3[%c2_23, %c0_24, %c0_25] : memref<3x1x256xf32, #tpu.memory_space<vmem>>, vector<1x1x256xf32>
    %48 = vector.shape_cast %47 : vector<1x1x256xf32> to vector<1x256xf32>
    %49 = arith.truncf %44 : vector<64x128xf32> to vector<64x128xbf16>
    %cst_26 = arith.constant dense<0.000000e+00> : vector<64x256xf32>
    %50 = tpu.matmul %49, %46, %cst_26 {dimension_numbers = #tpu.dot_dimension_numbers<[1], [0], [0], [1], [0, 0, 1, 1], [], []>} : vector<64x128xbf16>, vector<128x256xbf16>, vector<64x256xf32> -> vector<64x256xf32>
    %51 = vector.broadcast %48 : vector<1x256xf32> to vector<64x256xf32>
    %52 = arith.addf %50, %51 : vector<64x256xf32>
    %53 = vector.extract_strided_slice %52 {offsets = [0, 0], sizes = [64, 128], strides = [1, 1]} : vector<64x256xf32> to vector<64x128xf32>
    %54 = vector.extract_strided_slice %52 {offsets = [0, 128], sizes = [64, 128], strides = [1, 1]} : vector<64x256xf32> to vector<64x128xf32>
    %cst_27 = arith.constant 5.000000e-01 : f32
    %55 = vector.broadcast %cst_27 : f32 to vector<64x128xf32>
    %56 = arith.mulf %55, %53 : vector<64x128xf32>
    %57 = math.tanh %56 : vector<64x128xf32>
    %cst_28 = arith.constant 1.000000e+00 : f32
    %58 = vector.broadcast %cst_28 : f32 to vector<64x128xf32>
    %59 = arith.addf %57, %58 : vector<64x128xf32>
    %cst_29 = arith.constant 5.000000e-01 : f32
    %60 = vector.broadcast %cst_29 : f32 to vector<64x128xf32>
    %61 = arith.mulf %60, %59 : vector<64x128xf32>
    %cst_30 = arith.constant 0.000000e+00 : f32
    %62 = vector.broadcast %cst_30 : f32 to vector<64x128xf32>
    %63 = arith.maximumf %54, %62 : vector<64x128xf32>
    %64 = arith.subf %63, %44 : vector<64x128xf32>
    %65 = arith.mulf %61, %64 : vector<64x128xf32>
    %66 = arith.addf %44, %65 : vector<64x128xf32>
    %c0_31 = arith.constant 0 : index
    %c0_32 = arith.constant 0 : index
    %67 = vector.load %arg4[%c0_31, %c0_32] : memref<64x128xf32, #tpu.memory_space<vmem>>, vector<64x128xf32>
    tpu.vector_store %arg4[%c0_31, %c0_32], %66 {strides = array<i32>} : memref<64x128xf32, #tpu.memory_space<vmem>>, vector<64x128xf32>,
    return
  }
  func.func @transform_0(%arg0: i32) -> (i32, i32) {
    %c0_i32 = arith.constant 0 : i32
    %c0_i32_0 = arith.constant 0 : i32
    return %arg0, %c0_i32 : i32, i32
  }
  func.func @transform_1(%arg0: i32) -> (i32, i32, i32) {
    %c0_i32 = arith.constant 0 : i32
    %c0_i32_0 = arith.constant 0 : i32
    %c0_i32_1 = arith.constant 0 : i32
    %c0_i32_2 = arith.constant 0 : i32
    return %c0_i32, %c0_i32_0, %c0_i32_1 : i32, i32, i32
  }
  func.func @transform_2(%arg0: i32) -> (i32, i32, i32) {
    %c0_i32 = arith.constant 0 : i32
    %c0_i32_0 = arith.constant 0 : i32
    %c0_i32_1 = arith.constant 0 : i32
    %c0_i32_2 = arith.constant 0 : i32
    return %c0_i32, %c0_i32_0, %c0_i32_1 : i32, i32, i32
  }
  func.func @transform_3(%arg0: i32) -> (i32, i32) {
    %c0_i32 = arith.constant 0 : i32
    %c0_i32_0 = arith.constant 0 : i32
    return %arg0, %c0_i32 : i32, i32
  }
}

</mosaic_0001>

<bundles_post_ra>
// kernel: tpu_custom_call.1
= control target key start
LH: loop header
LB: loop body
LE: loop exit
PB: predicated region body
PF: predicated region fallthrough
CT: control target
= control target key end

     0   :  { %8 = vsyncpa [#allocation3], 0  ;;  %s1379_s0 = inlined_call_operand.hbm [shape: f32[64,128], index: 0, kind: input, shape index: {}]   ;;  %s1380_s1 = inlined_call_operand.hbm [shape: bf16[3,128,256], index: 1, kind: input, shape index: {}]   ;;  %s1381_s2 = inlined_call_operand.vmem [shape: f32[3,1,256], index: 2, kind: input, shape index: {}]   ;;  %s1382_s3 = inlined_call_operand.hbm [shape: f32[64,128], index: 3, kind: output, shape index: {}]  }
   0x1   :  { %9 = vsyncpa [#allocation6], 0 }
   0x2   :  { %10 = vsyncpa [#allocation4], 0  ;;  %s1093_s12 = smov [#allocation2]   ;;  %s1021_s16 = scalar_lea.hbm %s1379_s0, 1024 }
   0x3   :  { %s16_s13 = sshll.u32 %s1093_s12, 4  ;;  %p1022_p0 = scmp.ne.s32.totalorder %s1379_s0, %s1021_s16  ;;  %s17_s13 = int_to_ptr.vmem [resolvable:$true] %s16_s13 }
   0x4   :  { %p1025_p1 = scmp.lt.u32.totalorder %s1021_s16, %s1379_s0 }
   0x6   :  { %p1027_p2 = pnand %p1025_p1, %p1022_p0 }
   0x8   :  { %1030 = shalt.err (!%p1027_p2)
}
   0x9   :  { %s1031_s21 = scalar_lea.vmem %s17_s13, 1024  ;;  %p1036_p4 = scmp.lt.s32.totalorder %s17_s13, %s17_s13 }
   0xa   :  { %p1032_p3 = scmp.ne.s32.totalorder %s17_s13, %s1031_s21  ;;  %p1037_p5 = scmp.lt.s32.totalorder %s1031_s21, %s1031_s21 }
   0xc   :  { %p1038_p6 = por %p1037_p5, %p1036_p4 }
   0xe   :  { %p1039_p7 = pnand %p1038_p6, %p1032_p3 }
  0x10   :  { %1042 = shalt.err (!%p1039_p7)
}
  0x11   :  { %s1094_s22 = smov 128   ;;  %s1095_s23 = smov 8  }
  0x12   :  { %22 = dma.hbm_to_vmem [thread:$0]  %s1379_s0, 1024, %s17_s13, [#allocation3], %s1094_s22, %s1094_s22, %s1095_s23  }
  0x13   :  { %s1096_s26 = smov [#allocation5]   ;;  %s1043_s30 = scalar_lea.hbm %s1380_s1, 6144 }
  0x14   :  { %s28_s27 = sshll.u32 %s1096_s26, 4  ;;  %p1044_p8 = scmp.ne.s32.totalorder %s1380_s1, %s1043_s30  ;;  %s29_s27 = int_to_ptr.vmem [resolvable:$true] %s28_s27 }
  0x15   :  { %p1047_p9 = scmp.lt.u32.totalorder %s1043_s30, %s1380_s1 }
  0x17   :  { %p1049_p10 = pnand %p1047_p9, %p1044_p8 }
  0x19   :  { %1052 = shalt.err (!%p1049_p10)
}
  0x1a   :  { %s1053_s8 = scalar_lea.vmem %s29_s27, 6144  ;;  %p1058_p12 = scmp.lt.s32.totalorder %s29_s27, %s29_s27 }
  0x1b   :  { %p1054_p11 = scmp.ne.s32.totalorder %s29_s27, %s1053_s8  ;;  %p1059_p13 = scmp.lt.s32.totalorder %s1053_s8, %s1053_s8 }
  0x1d   :  { %p1060_p0 = por %p1059_p13, %p1058_p12 }
  0x1f   :  { %p1061_p1 = pnand %p1060_p0, %p1054_p11 }
  0x21   :  { %1064 = shalt.err (!%p1061_p1)
}
  0x22   :  { %34 = dma.hbm_to_vmem [thread:$0]  %s1380_s1, 6144, %s29_s27, [#allocation6], %s1094_s22, %s1094_s22, %s1095_s23  }
  0x23   :  { %1087 = dma.done.wait [#allocation3], 1024  }
  0x24   :  { %1088 = vsyncadd [#allocation3], 4294966272 }
  0x25   :  { %1089 = dma.done.wait [#allocation6], 6144  }
  0x26   :  { %1090 = vsyncadd [#allocation6], 4294961152  ;;  %v1097_v0 = vmov 0   ;;  %v901_v1 = vld [vmem:[#allocation5 + $0x4] ss:$8 sps:$4 sm:$0xff]   ;;  %v1158_v22 = vld [vmem:[#allocation2 + $0x10] sm:$0xff]  ;;  %v74_v47 = vlaneseq }
  0x27   :  { %196 = vmatprep.mubr.bf16.mxu0 %v1097_v0  ;;  %447 = vmatprep.mubr.bf16.mxu1 %v1097_v0  ;;  %v903_v2 = vld [vmem:[#allocation5] ss:$8 sps:$4 sm:$0xff]   ;;  %v904_v3 = vld [vmem:[#allocation5 + $0x14] ss:$8 sps:$4 sm:$0xff]   ;;  %v906_v4 = vld [vmem:[#allocation5 + $0x10] ss:$8 sps:$4 sm:$0xff]  }
  0x28   :  { %164 = vmatprep.subr.bf16.mxu0 %v901_v1  ;;  %v907_v5 = vld [vmem:[#allocation5 + $0x24] ss:$8 sps:$4 sm:$0xff]   ;;  %v909_v6 = vld [vmem:[#allocation5 + $0x20] ss:$8 sps:$4 sm:$0xff]   ;;  %v910_v7 = vld [vmem:[#allocation5 + $0x34] ss:$8 sps:$4 sm:$0xff]  }
  0x29   :  { %165 = vmatpush1.bf16.msra.mxu0 %v903_v2  ;;  %v912_v8 = vld [vmem:[#allocation5 + $0x30] ss:$8 sps:$4 sm:$0xff]   ;;  %v913_v9 = vld [vmem:[#allocation5 + $0x44] ss:$8 sps:$4 sm:$0xff]   ;;  %v915_v10 = vld [vmem:[#allocation5 + $0x40] ss:$8 sps:$4 sm:$0xff]  }
  0x2a   :  { %166 = vmatprep.subr.bf16.mxu0 %v904_v3  ;;  %v916_v11 = vld [vmem:[#allocation5 + $0x54] ss:$8 sps:$4 sm:$0xff]   ;;  %v925_v12 = vld [vmem:[#allocation5 + $0x84] ss:$8 sps:$4 sm:$0xff]   ;;  %v927_v13 = vld [vmem:[#allocation5 + $0x80] ss:$8 sps:$4 sm:$0xff]  }
  0x2b   :  { %415 = vmatprep.subr.bf16.mxu1 %v925_v12  ;;  %v918_v14 = vld [vmem:[#allocation5 + $0x50] ss:$8 sps:$4 sm:$0xff]   ;;  %v919_v15 = vld [vmem:[#allocation5 + $0x64] ss:$8 sps:$4 sm:$0xff]   ;;  %v921_v16 = vld [vmem:[#allocation5 + $0x60] ss:$8 sps:$4 sm:$0xff]  }
  0x2c   :  { %416 = vmatpush1.bf16.msra.mxu1 %v927_v13  ;;  %v922_v17 = vld [vmem:[#allocation5 + $0x74] ss:$8 sps:$4 sm:$0xff]   ;;  %v924_v18 = vld [vmem:[#allocation5 + $0x70] ss:$8 sps:$4 sm:$0xff]   ;;  %v1151_v19 = vld [vmem:[#allocation2] sm:$0xff]  ;;  %v75_v48 = vshrl.u32 %v74_v47, 7 }
  0x2d   :  { %167 = vmatpush1.bf16.msra.mxu0 %v906_v4  ;;  %v1153_v20 = vld [vmem:[#allocation2 + $0x8] sm:$0xff]  ;;  %v1160_v23 = vld [vmem:[#allocation2 + $0x18] sm:$0xff]  ;;  %v1165_v25 = vld [vmem:[#allocation2 + $0x20] sm:$0xff] }
  0x2e   :  { %168 = vmatprep.subr.bf16.mxu0 %v907_v5  ;;  %v69_v21 = vpack.c.bf16 %v1153_v20, %v1151_v19  ;;  %v70_v24 = vpack.c.bf16 %v1160_v23, %v1158_v22  ;;  %v1167_v26 = vld [vmem:[#allocation2 + $0x28] sm:$0xff]  ;;  %v1172_v28 = vld [vmem:[#allocation2 + $0x30] sm:$0xff]  ;;  %v1174_v29 = vld [vmem:[#allocation2 + $0x38] sm:$0xff]  ;;  %v1182_v49 = vsub.s32 0, %v75_v48  ;;  %v1191_v55 = vsub.s32 1, %v75_v48 }
  0x2f   :  { %v71_v27 = vpack.c.bf16 %v1167_v26, %v1165_v25  ;;  %v72_v30 = vpack.c.bf16 %v1174_v29, %v1172_v28  ;;  %v928_v31 = vld [vmem:[#allocation5 + $0x94] ss:$8 sps:$4 sm:$0xff]   ;;  %v930_v32 = vld [vmem:[#allocation5 + $0x90] ss:$8 sps:$4 sm:$0xff]   ;;  %v931_v33 = vld [vmem:[#allocation5 + $0xa4] ss:$8 sps:$4 sm:$0xff]  }
  0x30   :  { %417 = vmatprep.subr.bf16.mxu1 %v928_v31  ;;  %v933_v34 = vld [vmem:[#allocation5 + $0xa0] ss:$8 sps:$4 sm:$0xff]   ;;  %v934_v35 = vld [vmem:[#allocation5 + $0xb4] ss:$8 sps:$4 sm:$0xff]   ;;  %v936_v36 = vld [vmem:[#allocation5 + $0xb0] ss:$8 sps:$4 sm:$0xff]  }
  0x31   :  { %169 = vmatpush1.bf16.msra.mxu0 %v909_v6  ;;  %418 = vmatpush1.bf16.msra.mxu1 %v930_v32  ;;  %v937_v37 = vld [vmem:[#allocation5 + $0xc4] ss:$8 sps:$4 sm:$0xff]   ;;  %v939_v38 = vld [vmem:[#allocation5 + $0xc0] ss:$8 sps:$4 sm:$0xff]   ;;  %v940_v39 = vld [vmem:[#allocation5 + $0xd4] ss:$8 sps:$4 sm:$0xff]  }
  0x32   :  { %170 = vmatprep.subr.bf16.mxu0 %v910_v7  ;;  %419 = vmatprep.subr.bf16.mxu1 %v931_v33  ;;  %v942_v40 = vld [vmem:[#allocation5 + $0xd0] ss:$8 sps:$4 sm:$0xff]   ;;  %v943_v41 = vld [vmem:[#allocation5 + $0xe4] ss:$8 sps:$4 sm:$0xff]   ;;  %v945_v42 = vld [vmem:[#allocation5 + $0xe0] ss:$8 sps:$4 sm:$0xff]  }
  0x33   :  { %v946_v43 = vld [vmem:[#allocation5 + $0xf4] ss:$8 sps:$4 sm:$0xff]   ;;  %v948_v44 = vld [vmem:[#allocation5 + $0xf0] ss:$8 sps:$4 sm:$0xff]   ;;  %v1179_v45 = vld [vmem:[#allocation5 + $0x100] ss:$8 sps:$4 sm:$0xff]  }
  0x34   :  { %v951_v46 = vld [vmem:[#allocation5 + $0x104] ss:$8 sps:$4 sm:$0xff]   ;;  %v68_v50 = vld [vmem:[%s1381_s2] sm:$0x3] }
  0x35   :  { %171 = vmatpush1.bf16.msra.mxu0 %v912_v8  ;;  %420 = vmatpush1.bf16.msra.mxu1 %v933_v34  ;;  %v1188_v51 = vrot.slane %v68_v50, %v1182_v49  ;;  %v1195_v61 = vrot.slane %v68_v50, %v1191_v55 }
  0x36   :  { %172 = vmatprep.subr.bf16.mxu0 %v913_v9  ;;  %421 = vmatprep.subr.bf16.mxu1 %v934_v35 }
  0x39   :  { %173 = vmatpush1.bf16.msra.mxu0 %v915_v10  ;;  %422 = vmatpush1.bf16.msra.mxu1 %v936_v36 }
  0x3a   :  { %174 = vmatprep.subr.bf16.mxu0 %v916_v11  ;;  %423 = vmatprep.subr.bf16.mxu1 %v937_v37 }
  0x3d   :  { %175 = vmatpush1.bf16.msra.mxu0 %v918_v14  ;;  %424 = vmatpush1.bf16.msra.mxu1 %v939_v38 }
  0x3e   :  { %176 = vmatprep.subr.bf16.mxu0 %v919_v15  ;;  %425 = vmatprep.subr.bf16.mxu1 %v940_v39 }
  0x41   :  { %177 = vmatpush1.bf16.msra.mxu0 %v921_v16  ;;  %426 = vmatpush1.bf16.msra.mxu1 %v942_v40 }
  0x42   :  { %178 = vmatprep.subr.bf16.mxu0 %v922_v17  ;;  %427 = vmatprep.subr.bf16.mxu1 %v943_v41 }
  0x45   :  { %179 = vmatpush1.bf16.msra.mxu0 %v924_v18  ;;  %428 = vmatpush1.bf16.msra.mxu1 %v945_v42 }
  0x46   :  { %429 = vmatprep.subr.bf16.mxu1 %v946_v43  ;;  %666 = vmatprep.subr.bf16.mxu0 %v951_v46 }
  0x48   :  { %197 = vmatmul.mubr.bf16.vlgmr.msra.gmra.mrb[0].mxu0 %v69_v21 }
  0x49   :  { %206 = vmatprep.mubr.bf16.mxu0 %v1097_v0  ;;  %430 = vmatpush1.bf16.msra.mxu1 %v948_v44 }
  0x4a   :  { %879 = vmatprep.subr.bf16.mxu1 %v951_v46  ;;  %667 = vmatpush1.bf16.msra.mxu0 %v1179_v45 }
  0x50   :  { %207 = vmatmul.mubr.bf16.gmra.mrb[4].mxu0 %v70_v24 }
  0x51   :  { %216 = vmatprep.mubr.bf16.mxu0 %v1097_v0 }
  0x58   :  { %217 = vmatmul.mubr.bf16.gmra.mrb[8].mxu0 %v71_v27 }
  0x59   :  { %226 = vmatprep.mubr.bf16.mxu0 %v1097_v0 }
  0x60   :  { %227 = vmatmul.mubr.bf16.gmra.mrb[12].mxu0 %v72_v30 }
  0x61   :  { %698 = vmatprep.mubr.bf16.mxu0 %v1097_v0 }
 0x11b   :  { %v198_v52 = vpop.f32.mrb[0].mxu0 }
 0x11c   :  { %v199_v53 = vadd.f32 %v198_v52, %v1188_v51  ;;  %v200_v54 = vpop.f32.mrb[1].mxu0 }
 0x11d   :  { %v202_v56 = vpop.f32.mrb[2].mxu0  ;;  %v201_v2 = vadd.f32 %v200_v54, %v1195_v61 }
 0x11e   :  { %v237_v57 = vmul.f32 0.5, %v199_v53  ;;  %v203_v58 = vadd.f32 %v202_v56, %v1188_v51  ;;  %v204_v59 = vpop.f32.mrb[3].mxu0 }
 0x11f   :  { %v205_v7 = vadd.f32 %v204_v59, %v1195_v61  ;;  %v269_v9 = vmax.f32 %v201_v2, 0.0 }
 0x120   :  { %973 = vtanh.f32 %v237_v57  ;;  %v238_v60 = vmul.f32 0.5, %v203_v58 }
 0x121   :  { %v270_v12 = vmax.f32 %v205_v7, 0.0  ;;  %v277_v18 = vsub.f32 %v269_v9, %v1151_v19 }
 0x122   :  { %975 = vtanh.f32 %v238_v60 }
 0x123   :  { %v208_v62 = vpop.f32.mrb[4].mxu0  ;;  %v278_v35 = vsub.f32 %v270_v12, %v1153_v20 }
 0x124   :  { %v209_v63 = vadd.f32 %v208_v62, %v1188_v51  ;;  %v210_v1 = vpop.f32.mrb[5].mxu0 }
 0x125   :  { %v212_v3 = vpop.f32.mrb[6].mxu0  ;;  %v211_v24 = vadd.f32 %v210_v1, %v1195_v61 }
 0x126   :  { %v239_v4 = vmul.f32 0.5, %v209_v63  ;;  %v213_v5 = vadd.f32 %v212_v3, %v1188_v51  ;;  %v214_v6 = vpop.f32.mrb[7].mxu0 }
 0x127   :  { %v215_v36 = vadd.f32 %v214_v6, %v1195_v61  ;;  %v271_v39 = vmax.f32 %v211_v24, 0.0 }
 0x128   :  { %977 = vtanh.f32 %v239_v4  ;;  %v240_v8 = vmul.f32 0.5, %v213_v5 }
 0x129   :  { %v272_v44 = vmax.f32 %v215_v36, 0.0  ;;  %v279_v54 = vsub.f32 %v271_v39, %v1158_v22 }
 0x12a   :  { %v974_v10 = vpop.eup %973  ;;  %979 = vtanh.f32 %v240_v8 }
 0x12b   :  { %v253_v11 = vadd.f32 1.0, %v974_v10  ;;  %v218_v13 = vpop.f32.mrb[8].mxu0  ;;  %v280_v63 = vsub.f32 %v272_v44, %v1160_v23  ;;  %v957_v44 = vld [vmem:[#allocation5 + $0x124] ss:$8 sps:$4 sm:$0xff]  }
 0x12c   :  { %v976_v14 = vpop.eup %975  ;;  %v219_v15 = vadd.f32 %v218_v13, %v1188_v51  ;;  %v220_v16 = vpop.f32.mrb[9].mxu0 }
 0x12d   :  { %v261_v17 = vmul.f32 0.5, %v253_v11  ;;  %v254_v21 = vadd.f32 1.0, %v976_v14  ;;  %v222_v27 = vpop.f32.mrb[10].mxu0  ;;  %v221_v48 = vadd.f32 %v220_v16, %v1195_v61 }
 0x12e   :  { %v241_v30 = vmul.f32 0.5, %v219_v15  ;;  %v223_v31 = vadd.f32 %v222_v27, %v1188_v51  ;;  %v224_v32 = vpop.f32.mrb[11].mxu0 }
 0x12f   :  { %v285_v33 = vmul.f32 %v277_v18, %v261_v17  ;;  %v262_v34 = vmul.f32 0.5, %v254_v21  ;;  %v225_v1 = vadd.f32 %v224_v32, %v1195_v61  ;;  %v273_v2 = vmax.f32 %v221_v48, 0.0  ;;  %v961_v48 = vld [vmem:[#allocation5 + $0x140] ss:$8 sps:$4 sm:$0xff]  }
 0x130   :  { %981 = vtanh.f32 %v241_v30  ;;  %v242_v37 = vmul.f32 0.5, %v223_v31 }
 0x131   :  { %v286_v38 = vmul.f32 %v278_v35, %v262_v34  ;;  %v1208_v41 = vadd.f32 %v285_v33, %v1151_v19  ;;  %v274_v8 = vmax.f32 %v225_v1, 0.0  ;;  %v281_v10 = vsub.f32 %v273_v2, %v1165_v25 }
 0x132   :  { %v978_v40 = vpop.eup %977  ;;  %983 = vtanh.f32 %v242_v37 }
 0x133   :  { %v1211_v42 = vadd.f32 %v286_v38, %v1153_v20  ;;  %v255_v43 = vadd.f32 1.0, %v978_v40  ;;  %v228_v46 = vpop.f32.mrb[12].mxu0  ;;  %v954_v40 = vld [vmem:[#allocation5 + $0x114] ss:$8 sps:$4 sm:$0xff]  }
 0x134   :  { %v980_v47 = vpop.eup %979  ;;  %v229_v50 = vadd.f32 %v228_v46, %v1188_v51  ;;  %v230_v52 = vpop.f32.mrb[13].mxu0  ;;  %668 = vmatprep.subr.bf16.mxu0 %v954_v40  ;;  %v955_v46 = vld [vmem:[#allocation5 + $0x120] ss:$8 sps:$4 sm:$0xff]  }
 0x135   :  { %v263_v53 = vmul.f32 0.5, %v255_v43  ;;  %v256_v56 = vadd.f32 1.0, %v980_v47  ;;  %v232_v57 = vpop.f32.mrb[14].mxu0  ;;  %v320_v19 = vpack.c.bf16 %v1211_v42, %v1208_v41  ;;  %v231_v13 = vadd.f32 %v230_v52, %v1195_v61  ;;  %v952_v43 = vld [vmem:[#allocation5 + $0x110] ss:$8 sps:$4 sm:$0xff]  }
 0x136   :  { %v243_v58 = vmul.f32 0.5, %v229_v50  ;;  %v233_v20 = vadd.f32 %v232_v57, %v1188_v51  ;;  %v234_v59 = vpop.f32.mrb[15].mxu0  ;;  %669 = vmatpush1.bf16.msra.mxu0 %v952_v43  ;;  %v963_v47 = vld [vmem:[#allocation5 + $0x144] ss:$8 sps:$4 sm:$0xff]   ;;  %v966_v50 = vld [vmem:[#allocation5 + $0x154] ss:$8 sps:$4 sm:$0xff]  }
 0x137   :  { %v287_v60 = vmul.f32 %v279_v54, %v263_v53  ;;  %v264_v62 = vmul.f32 0.5, %v256_v56  ;;  %448 = vmatmul.mubr.bf16.vlgmr.msra.gmra.mrb[0].mxu1 %v320_v19  ;;  %v235_v16 = vadd.f32 %v234_v59, %v1195_v61  ;;  %v275_v17 = vmax.f32 %v231_v13, 0.0  ;;  %670 = vmatprep.subr.bf16.mxu0 %v957_v44  ;;  %v964_v52 = vld [vmem:[#allocation5 + $0x150] ss:$8 sps:$4 sm:$0xff]   ;;  %v969_v53 = vld [vmem:[#allocation5 + $0x164] ss:$8 sps:$4 sm:$0xff]  }
 0x138   :  { %985 = vtanh.f32 %v243_v58  ;;  %v244_v3 = vmul.f32 0.5, %v233_v20  ;;  %457 = vmatprep.mubr.bf16.mxu1 %v1097_v0  ;;  %887 = vmatpush1.bf16.msra.mxu1 %v1179_v45  ;;  %v967_v54 = vld [vmem:[#allocation5 + $0x160] ss:$8 sps:$4 sm:$0xff]   ;;  %v972_v56 = vld [vmem:[#allocation5 + $0x174] ss:$8 sps:$4 sm:$0xff]  }
 0x139   :  { %v288_v4 = vmul.f32 %v280_v63, %v264_v62  ;;  %v1224_v51 = vadd.f32 %v287_v60, %v1158_v22  ;;  %v282_v22 = vsub.f32 %v274_v8, %v1167_v26  ;;  %v276_v30 = vmax.f32 %v235_v16, 0.0  ;;  %880 = vmatprep.subr.bf16.mxu1 %v954_v40  ;;  %v970_v57 = vld [vmem:[#allocation5 + $0x170] ss:$8 sps:$4 sm:$0xff]   ;;  %v845_v19 = vld [vmem:[%s1381_s2 + $0x2] sm:$0x3] }
 0x13a   :  { %v982_v5 = vpop.eup %981  ;;  %987 = vtanh.f32 %v244_v3  ;;  %v283_v33 = vsub.f32 %v275_v17, %v1172_v28  ;;  %671 = vmatpush1.bf16.msra.mxu0 %v955_v46  ;;  %v1260_v58 = vrot.slane %v845_v19, %v1182_v49 }
 0x13b   :  { %v1227_v6 = vadd.f32 %v288_v4, %v1160_v23  ;;  %v257_v7 = vadd.f32 1.0, %v982_v5  ;;  %v284_v37 = vsub.f32 %v276_v30, %v1174_v29  ;;  %v1265_v4 = vrot.slane %v845_v19, %v1191_v55 }
 0x13c   :  { %v984_v9 = vpop.eup %983  ;;  %888 = vmatpush1.bf16.msra.mxu1 %v952_v43 }
 0x13d   :  { %v265_v11 = vmul.f32 0.5, %v257_v7  ;;  %v258_v12 = vadd.f32 1.0, %v984_v9  ;;  %v321_v45 = vpack.c.bf16 %v1227_v6, %v1224_v51  ;;  %881 = vmatprep.subr.bf16.mxu1 %v957_v44 }
 0x13f   :  { %v289_v14 = vmul.f32 %v281_v10, %v265_v11  ;;  %v266_v15 = vmul.f32 0.5, %v258_v12  ;;  %458 = vmatmul.mubr.bf16.gmra.mrb[4].mxu1 %v321_v45 }
 0x140   :  { %467 = vmatprep.mubr.bf16.mxu1 %v1097_v0  ;;  %889 = vmatpush1.bf16.msra.mxu1 %v955_v46 }
 0x141   :  { %v290_v23 = vmul.f32 %v282_v22, %v266_v15  ;;  %v1237_v21 = vadd.f32 %v289_v14, %v1165_v25 }
 0x142   :  { %v986_v18 = vpop.eup %985 }
 0x143   :  { %v1240_v24 = vadd.f32 %v290_v23, %v1167_v26  ;;  %v259_v27 = vadd.f32 1.0, %v986_v18 }
 0x144   :  { %v988_v31 = vpop.eup %987 }
 0x145   :  { %v267_v32 = vmul.f32 0.5, %v259_v27  ;;  %v260_v34 = vadd.f32 1.0, %v988_v31  ;;  %v322_v61 = vpack.c.bf16 %v1240_v24, %v1237_v21 }
 0x147   :  { %v291_v35 = vmul.f32 %v283_v33, %v267_v32  ;;  %v268_v36 = vmul.f32 0.5, %v260_v34  ;;  %468 = vmatmul.mubr.bf16.gmra.mrb[8].mxu1 %v322_v61 }
 0x148   :  { %477 = vmatprep.mubr.bf16.mxu1 %v1097_v0 }
 0x149   :  { %v292_v25 = vmul.f32 %v284_v37, %v268_v36  ;;  %v1248_v26 = vadd.f32 %v291_v35, %v1172_v28  ;;  %v960_v28 = vld [vmem:[#allocation5 + $0x134] ss:$8 sps:$4 sm:$0xff]  }
 0x14a   :  { %672 = vmatprep.subr.bf16.mxu0 %v960_v28  ;;  %882 = vmatprep.subr.bf16.mxu1 %v960_v28 }
 0x14b   :  { %v1251_v38 = vadd.f32 %v292_v25, %v1174_v29  ;;  %v958_v29 = vld [vmem:[#allocation5 + $0x130] ss:$8 sps:$4 sm:$0xff]  }
 0x14c   :  { %673 = vmatpush1.bf16.msra.mxu0 %v958_v29  ;;  %890 = vmatpush1.bf16.msra.mxu1 %v958_v29 }
 0x14d   :  { %v323_v39 = vpack.c.bf16 %v1251_v38, %v1248_v26  ;;  %674 = vmatprep.subr.bf16.mxu0 %v963_v47  ;;  %883 = vmatprep.subr.bf16.mxu1 %v963_v47 }
 0x14f   :  { %478 = vmatmul.mubr.bf16.gmra.mrb[12].mxu1 %v323_v39 }
 0x150   :  { %718 = vmatprep.mubr.bf16.mxu1 %v1097_v0  ;;  %675 = vmatpush1.bf16.msra.mxu0 %v961_v48 }
 0x151   :  { %891 = vmatpush1.bf16.msra.mxu1 %v961_v48  ;;  %676 = vmatprep.subr.bf16.mxu0 %v966_v50 }
 0x152   :  { %884 = vmatprep.subr.bf16.mxu1 %v966_v50 }
 0x154   :  { %677 = vmatpush1.bf16.msra.mxu0 %v964_v52 }
 0x155   :  { %892 = vmatpush1.bf16.msra.mxu1 %v964_v52  ;;  %678 = vmatprep.subr.bf16.mxu0 %v969_v53 }
 0x156   :  { %885 = vmatprep.subr.bf16.mxu1 %v969_v53 }
 0x158   :  { %679 = vmatpush1.bf16.msra.mxu0 %v967_v54 }
 0x159   :  { %893 = vmatpush1.bf16.msra.mxu1 %v967_v54  ;;  %680 = vmatprep.subr.bf16.mxu0 %v972_v56 }
 0x15a   :  { %886 = vmatprep.subr.bf16.mxu1 %v972_v56 }
 0x15c   :  { %681 = vmatpush1.bf16.msra.mxu0 %v970_v57 }
 0x15d   :  { %894 = vmatpush1.bf16.msra.mxu1 %v970_v57 }
 0x20a   :  { %v449_v20 = vpop.f32.mrb[0].mxu1 }
 0x20b   :  { %v450_v59 = vadd.f32 %v449_v20, %v1260_v58  ;;  %v451_v60 = vpop.f32.mrb[1].mxu1 }
 0x20c   :  { %v453_v62 = vpop.f32.mrb[2].mxu1  ;;  %v452_v9 = vadd.f32 %v451_v60, %v1265_v4 }
 0x20d   :  { %v488_v63 = vmul.f32 0.5, %v450_v59  ;;  %v454_v1 = vadd.f32 %v453_v62, %v1260_v58  ;;  %v455_v2 = vpop.f32.mrb[3].mxu1 }
 0x20e   :  { %v456_v45 = vadd.f32 %v455_v2, %v1265_v4  ;;  %v520_v15 = vmax.f32 %v452_v9, 0.0 }
 0x20f   :  { %989 = vtanh.f32 %v488_v63  ;;  %v489_v3 = vmul.f32 0.5, %v454_v1 }
 0x210   :  { %v521_v23 = vmax.f32 %v456_v45, 0.0  ;;  %v528_v32 = vsub.f32 %v520_v15, %v1208_v41 }
 0x211   :  { %991 = vtanh.f32 %v489_v3 }
 0x212   :  { %v459_v5 = vpop.f32.mrb[4].mxu1  ;;  %v529_v40 = vsub.f32 %v521_v23, %v1211_v42 }
 0x213   :  { %v460_v7 = vadd.f32 %v459_v5, %v1260_v58  ;;  %v461_v8 = vpop.f32.mrb[5].mxu1 }
 0x214   :  { %v463_v10 = vpop.f32.mrb[6].mxu1  ;;  %v462_v34 = vadd.f32 %v461_v8, %v1265_v4 }
 0x215   :  { %v490_v11 = vmul.f32 0.5, %v460_v7  ;;  %v464_v12 = vadd.f32 %v463_v10, %v1260_v58  ;;  %v465_v13 = vpop.f32.mrb[7].mxu1 }
 0x216   :  { %v466_v43 = vadd.f32 %v465_v13, %v1265_v4  ;;  %v522_v28 = vmax.f32 %v462_v34, 0.0 }
 0x217   :  { %993 = vtanh.f32 %v490_v11  ;;  %v491_v14 = vmul.f32 0.5, %v464_v12 }
 0x218   :  { %v523_v52 = vmax.f32 %v466_v43, 0.0  ;;  %v530_v60 = vsub.f32 %v522_v28, %v1224_v51 }
 0x219   :  { %v990_v22 = vpop.eup %989  ;;  %995 = vtanh.f32 %v491_v14 }
 0x21a   :  { %v504_v16 = vadd.f32 1.0, %v990_v22  ;;  %v469_v17 = vpop.f32.mrb[8].mxu1  ;;  %v531_v5 = vsub.f32 %v523_v52, %v1227_v6 }
 0x21b   :  { %v992_v18 = vpop.eup %991  ;;  %v470_v27 = vadd.f32 %v469_v17, %v1260_v58  ;;  %v471_v30 = vpop.f32.mrb[9].mxu1 }
 0x21c   :  { %v512_v31 = vmul.f32 0.5, %v504_v16  ;;  %v505_v33 = vadd.f32 1.0, %v992_v18  ;;  %v473_v61 = vpop.f32.mrb[10].mxu1  ;;  %v472_v56 = vadd.f32 %v471_v30, %v1265_v4 }
 0x21d   :  { %v492_v35 = vmul.f32 0.5, %v470_v27  ;;  %v474_v36 = vadd.f32 %v473_v61, %v1260_v58  ;;  %v475_v37 = vpop.f32.mrb[11].mxu1 }
 0x21e   :  { %v536_v25 = vmul.f32 %v528_v32, %v512_v31  ;;  %v513_v39 = vmul.f32 0.5, %v505_v33  ;;  %v476_v7 = vadd.f32 %v475_v37, %v1265_v4  ;;  %v524_v8 = vmax.f32 %v472_v56, 0.0 }
 0x21f   :  { %997 = vtanh.f32 %v492_v35  ;;  %v493_v44 = vmul.f32 0.5, %v474_v36 }
 0x220   :  { %v537_v46 = vmul.f32 %v529_v40, %v513_v39  ;;  %v1278_v47 = vadd.f32 %v536_v25, %v1208_v41  ;;  %v525_v45 = vmax.f32 %v476_v7, 0.0  ;;  %v532_v15 = vsub.f32 %v524_v8, %v1237_v21 }
 0x221   :  { %v994_v29 = vpop.eup %993  ;;  %999 = vtanh.f32 %v493_v44 }
 0x222   :  { %v1281_v48 = vadd.f32 %v537_v46, %v1211_v42  ;;  %v506_v50 = vadd.f32 1.0, %v994_v29  ;;  %v479_v53 = vpop.f32.mrb[12].mxu1  ;;  %v862_v29 = vld [vmem:[%s1381_s2 + $0x4] sm:$0x3]  ;;  %s1098_s2 = smov [#allocation7]  }
 0x223   :  { %v996_v54 = vpop.eup %995  ;;  %v480_v57 = vadd.f32 %v479_v53, %v1260_v58  ;;  %v481_v19 = vpop.f32.mrb[13].mxu1  ;;  %s816_s15 = sshll.u32 %s1098_s2, 4  ;;  %s817_s15 = int_to_ptr.vmem [resolvable:$true] %s816_s15 }
 0x224   :  { %v571_v20 = vpack.c.bf16 %v1281_v48, %v1278_v47  ;;  %v514_v59 = vmul.f32 0.5, %v506_v50  ;;  %v507_v41 = vadd.f32 1.0, %v996_v54  ;;  %v483_v62 = vpop.f32.mrb[14].mxu1  ;;  %v482_v23 = vadd.f32 %v481_v19, %v1265_v4  ;;  %s1065_s16 = scalar_lea.vmem %s817_s15, 1024  ;;  %p1070_p3 = scmp.lt.s32.totalorder %s817_s15, %s817_s15 }
 0x225   :  { %v494_v63 = vmul.f32 0.5, %v480_v57  ;;  %v484_v42 = vadd.f32 %v483_v62, %v1260_v58  ;;  %v485_v1 = vpop.f32.mrb[15].mxu1  ;;  %v1327_v50 = vrot.slane %v862_v29, %v1182_v49  ;;  %v1332_v19 = vrot.slane %v862_v29, %v1191_v55  ;;  %p1066_p2 = scmp.ne.s32.totalorder %s817_s15, %s1065_s16  ;;  %p1071_p4 = scmp.lt.s32.totalorder %s1065_s16, %s1065_s16 }
 0x226   :  { %v538_v2 = vmul.f32 %v530_v60, %v514_v59  ;;  %v515_v3 = vmul.f32 0.5, %v507_v41  ;;  %699 = vmatmul.mubr.bf16.vlgmr.msra.gmra.mrb[16].mxu0 %v571_v20  ;;  %v486_v30 = vadd.f32 %v485_v1, %v1265_v4  ;;  %v526_v31 = vmax.f32 %v482_v23, 0.0 }
 0x227   :  { %1001 = vtanh.f32 %v494_v63  ;;  %v495_v9 = vmul.f32 0.5, %v484_v42  ;;  %708 = vmatprep.mubr.bf16.mxu0 %v1097_v0  ;;  %p1072_p5 = por %p1071_p4, %p1070_p3 }
 0x228   :  { %v539_v10 = vmul.f32 %v531_v5, %v515_v3  ;;  %v1293_v12 = vadd.f32 %v538_v2, %v1224_v51  ;;  %v533_v51 = vsub.f32 %v525_v45, %v1240_v24  ;;  %v527_v35 = vmax.f32 %v486_v30, 0.0 }
 0x229   :  { %v998_v11 = vpop.eup %997  ;;  %1003 = vtanh.f32 %v495_v9  ;;  %v534_v39 = vsub.f32 %v526_v31, %v1248_v26  ;;  %p1073_p6 = pnand %p1072_p5, %p1066_p2 }
 0x22a   :  { %v1296_v58 = vadd.f32 %v539_v10, %v1227_v6  ;;  %v508_v13 = vadd.f32 1.0, %v998_v11  ;;  %v535_v44 = vsub.f32 %v527_v35, %v1251_v38 }
 0x22b   :  { %v1000_v14 = vpop.eup %999 }
 0x22c   :  { %v516_v22 = vmul.f32 0.5, %v508_v13  ;;  %v509_v16 = vadd.f32 1.0, %v1000_v14  ;;  %v572_v17 = vpack.c.bf16 %v1296_v58, %v1293_v12 }
 0x22e   :  { %v540_v18 = vmul.f32 %v532_v15, %v516_v22  ;;  %v517_v27 = vmul.f32 0.5, %v509_v16  ;;  %709 = vmatmul.mubr.bf16.gmra.mrb[20].mxu0 %v572_v17 }
 0x230   :  { %v541_v6 = vmul.f32 %v533_v51, %v517_v27  ;;  %v1305_v33 = vadd.f32 %v540_v18, %v1237_v21 }
 0x231   :  { %v1002_v32 = vpop.eup %1001 }
 0x232   :  { %v1308_v34 = vadd.f32 %v541_v6, %v1240_v24  ;;  %v510_v61 = vadd.f32 1.0, %v1002_v32 }
 0x233   :  { %v1004_v36 = vpop.eup %1003 }
 0x234   :  { %v573_v37 = vpack.c.bf16 %v1308_v34, %v1305_v33  ;;  %v518_v25 = vmul.f32 0.5, %v510_v61  ;;  %v511_v4 = vadd.f32 1.0, %v1004_v36 }
 0x236   :  { %v542_v40 = vmul.f32 %v534_v39, %v518_v25  ;;  %v519_v43 = vmul.f32 0.5, %v511_v4  ;;  %719 = vmatmul.mubr.bf16.vlgmr.msra.gmra.mrb[16].mxu1 %v573_v37 }
 0x237   :  { %728 = vmatprep.mubr.bf16.mxu1 %v1097_v0 }
 0x238   :  { %v543_v21 = vmul.f32 %v535_v44, %v519_v43  ;;  %v1316_v24 = vadd.f32 %v542_v40, %v1248_v26 }
 0x23a   :  { %v1319_v46 = vadd.f32 %v543_v21, %v1251_v38 }
 0x23c   :  { %v574_v28 = vpack.c.bf16 %v1319_v46, %v1316_v24 }
 0x23e   :  { %729 = vmatmul.mubr.bf16.gmra.mrb[20].mxu1 %v574_v28 }
 0x2f9   :  { %v700_v52 = vpop.f32.mrb[16].mxu0 }
 0x2fa   :  { %v701_v0 = vadd.f32 %v700_v52, %v1327_v50  ;;  %v702_v53 = vpop.f32.mrb[17].mxu0 }
 0x2fb   :  { %v704_v26 = vpop.f32.mrb[18].mxu0  ;;  %v703_v60 = vadd.f32 %v702_v53, %v1332_v19 }
 0x2fc   :  { %v739_v54 = vmul.f32 0.5, %v701_v0  ;;  %v705_v38 = vadd.f32 %v704_v26, %v1327_v50  ;;  %v706_v56 = vpop.f32.mrb[19].mxu0 }
 0x2fd   :  { %v707_v1 = vadd.f32 %v706_v56, %v1332_v19  ;;  %v771_v3 = vmax.f32 %v703_v60, 0.0 }
 0x2fe   :  { %1005 = vtanh.f32 %v739_v54  ;;  %v740_v57 = vmul.f32 0.5, %v705_v38 }
 0x2ff   :  { %v772_v7 = vmax.f32 %v707_v1, 0.0  ;;  %v779_v45 = vsub.f32 %v771_v3, %v1278_v47 }
 0x300   :  { %1007 = vtanh.f32 %v740_v57 }
 0x301   :  { %v710_v20 = vpop.f32.mrb[20].mxu0  ;;  %v780_v51 = vsub.f32 %v772_v7, %v1281_v48 }
 0x302   :  { %v711_v59 = vadd.f32 %v710_v20, %v1327_v50  ;;  %v712_v49 = vpop.f32.mrb[21].mxu0 }
 0x303   :  { %v714_v41 = vpop.f32.mrb[22].mxu0  ;;  %v713_v15 = vadd.f32 %v712_v49, %v1332_v19 }
 0x304   :  { %v741_v62 = vmul.f32 0.5, %v711_v59  ;;  %v715_v63 = vadd.f32 %v714_v41, %v1327_v50  ;;  %v716_v42 = vpop.f32.mrb[23].mxu0 }
 0x305   :  { %v717_v30 = vadd.f32 %v716_v42, %v1332_v19  ;;  %v773_v61 = vmax.f32 %v713_v15, 0.0 }
 0x306   :  { %1009 = vtanh.f32 %v741_v62  ;;  %v742_v2 = vmul.f32 0.5, %v715_v63 }
 0x307   :  { %v774_v25 = vmax.f32 %v717_v30, 0.0  ;;  %v781_v21 = vsub.f32 %v773_v61, %v1293_v12 }
 0x308   :  { %v1006_v5 = vpop.eup %1005  ;;  %1011 = vtanh.f32 %v742_v2 }
 0x309   :  { %v755_v55 = vadd.f32 1.0, %v1006_v5  ;;  %v720_v8 = vpop.f32.mrb[16].mxu1  ;;  %v782_v54 = vsub.f32 %v774_v25, %v1296_v58 }
 0x30a   :  { %v1008_v9 = vpop.eup %1007  ;;  %v721_v10 = vadd.f32 %v720_v8, %v1327_v50  ;;  %v722_v11 = vpop.f32.mrb[17].mxu1 }
 0x30b   :  { %v763_v13 = vmul.f32 0.5, %v755_v55  ;;  %v756_v14 = vadd.f32 1.0, %v1008_v9  ;;  %v724_v22 = vpop.f32.mrb[18].mxu1 }
 0x30c   :  { %v743_v16 = vmul.f32 0.5, %v721_v10  ;;  %v725_v23 = vadd.f32 %v724_v22, %v1327_v50  ;;  %v726_v17 = vpop.f32.mrb[19].mxu1 }
 0x30d   :  { %v787_v18 = vmul.f32 %v779_v45, %v763_v13  ;;  %v764_v27 = vmul.f32 0.5, %v756_v14  ;;  %v727_v38 = vadd.f32 %v726_v17, %v1332_v19 }
 0x30e   :  { %1013 = vtanh.f32 %v743_v16  ;;  %v744_v6 = vmul.f32 0.5, %v725_v23 }
 0x30f   :  { %v795_v31 = vadd.f32 %v787_v18, %v1278_v47  ;;  %v788_v32 = vmul.f32 %v780_v51, %v764_v27  ;;  %v723_v47 = vadd.f32 %v722_v11, %v1332_v19 }
 0x310   :  { %v1010_v35 = vpop.eup %1009  ;;  %1015 = vtanh.f32 %v744_v6 }
 0x311   :  { %803 = vst [vmem:[#allocation7] sm:$0xff] %v795_v31  ;;  %v796_v36 = vadd.f32 %v788_v32, %v1281_v48  ;;  %v757_v37 = vadd.f32 1.0, %v1010_v35  ;;  %v730_v39 = vpop.f32.mrb[20].mxu1  ;;  %v775_v59 = vmax.f32 %v723_v47, 0.0 }
 0x312   :  { %v1012_v4 = vpop.eup %1011  ;;  %v731_v40 = vadd.f32 %v730_v39, %v1327_v50  ;;  %v732_v43 = vpop.f32.mrb[21].mxu1 }
 0x313   :  { %804 = vst [vmem:[#allocation7 + $0x8] sm:$0xff] %v796_v36  ;;  %v765_v44 = vmul.f32 0.5, %v757_v37  ;;  %v758_v28 = vadd.f32 1.0, %v1012_v4  ;;  %v734_v29 = vpop.f32.mrb[22].mxu1  ;;  %v783_v42 = vsub.f32 %v775_v59, %v1305_v33  ;;  %v733_v2 = vadd.f32 %v732_v43, %v1332_v19 }
 0x314   :  { %v745_v52 = vmul.f32 0.5, %v731_v40  ;;  %v735_v0 = vadd.f32 %v734_v29, %v1327_v50  ;;  %v736_v53 = vpop.f32.mrb[23].mxu1  ;;  %v776_v50 = vmax.f32 %v727_v38, 0.0 }
 0x315   :  { %v789_v48 = vmul.f32 %v781_v21, %v765_v44  ;;  %v766_v26 = vmul.f32 0.5, %v758_v28  ;;  %v737_v55 = vadd.f32 %v736_v53, %v1332_v19 }
 0x316   :  { %1017 = vtanh.f32 %v745_v52  ;;  %v746_v56 = vmul.f32 0.5, %v735_v0 }
 0x317   :  { %v797_v57 = vadd.f32 %v789_v48, %v1293_v12  ;;  %v790_v20 = vmul.f32 %v782_v54, %v766_v26  ;;  %v784_v12 = vsub.f32 %v776_v50, %v1308_v34  ;;  %v778_v13 = vmax.f32 %v737_v55, 0.0 }
 0x318   :  { %v1014_v49 = vpop.eup %1013  ;;  %1019 = vtanh.f32 %v746_v56 }
 0x319   :  { %805 = vst [vmem:[#allocation7 + $0x10] sm:$0xff] %v797_v57  ;;  %v798_v60 = vadd.f32 %v790_v20, %v1296_v58  ;;  %v759_v41 = vadd.f32 1.0, %v1014_v49  ;;  %v777_v58 = vmax.f32 %v733_v2, 0.0  ;;  %v786_v19 = vsub.f32 %v778_v13, %v1319_v46 }
 0x31a   :  { %v1016_v62 = vpop.eup %1015 }
 0x31b   :  { %806 = vst [vmem:[#allocation7 + $0x18] sm:$0xff] %v798_v60  ;;  %v767_v63 = vmul.f32 0.5, %v759_v41  ;;  %v760_v1 = vadd.f32 1.0, %v1016_v62  ;;  %v785_v15 = vsub.f32 %v777_v58, %v1316_v24 }
 0x31d   :  { %v791_v3 = vmul.f32 %v783_v42, %v767_v63  ;;  %v768_v5 = vmul.f32 0.5, %v760_v1 }
 0x31f   :  { %v799_v7 = vadd.f32 %v791_v3, %v1305_v33  ;;  %v792_v8 = vmul.f32 %v784_v12, %v768_v5 }
 0x320   :  { %v1018_v9 = vpop.eup %1017 }
 0x321   :  { %807 = vst [vmem:[#allocation7 + $0x20] sm:$0xff] %v799_v7  ;;  %v800_v10 = vadd.f32 %v792_v8, %v1308_v34  ;;  %v761_v11 = vadd.f32 1.0, %v1018_v9 }
 0x322   :  { %v1020_v45 = vpop.eup %1019 }
 0x323   :  { %808 = vst [vmem:[#allocation7 + $0x28] sm:$0xff] %v800_v10  ;;  %v769_v14 = vmul.f32 0.5, %v761_v11  ;;  %v762_v22 = vadd.f32 1.0, %v1020_v45 }
 0x325   :  { %v793_v16 = vmul.f32 %v785_v15, %v769_v14  ;;  %v770_v23 = vmul.f32 0.5, %v762_v22 }
 0x327   :  { %v801_v33 = vadd.f32 %v793_v16, %v1316_v24  ;;  %v794_v17 = vmul.f32 %v786_v19, %v770_v23 }
 0x329   :  { %809 = vst [vmem:[#allocation7 + $0x30] sm:$0xff] %v801_v33  ;;  %v802_v34 = vadd.f32 %v794_v17, %v1319_v46 }
 0x32b   :  { %810 = vst [vmem:[#allocation7 + $0x38] sm:$0xff] %v802_v34 }
 0x32c   :  { %1076 = shalt.err (!%p1073_p6)
}
 0x32d   :  { %s1077_s19 = scalar_lea.hbm %s1382_s3, 1024 }
 0x32e   :  { %p1078_p7 = scmp.ne.s32.totalorder %s1382_s3, %s1077_s19  ;;  %p1081_p8 = scmp.lt.u32.totalorder %s1077_s19, %s1382_s3 }
 0x330   :  { %p1083_p9 = pnand %p1081_p8, %p1078_p7 }
 0x332   :  { %1086 = shalt.err (!%p1083_p9)
}
 0x333   :  { %822 = dma.vmem_to_hbm [thread:$0]  %s817_s15, 1024, %s1382_s3, [#allocation4], %s1094_s22, %s1094_s22, %s1095_s23  }
 0x334   :  { %1091 = dma.done.wait [#allocation4], 1024  }
 0x335   :  { %1092 = vsyncadd [#allocation4], 4294966272 }
 0x336   :  { %826 = vsyncpa [#allocation3], 1 }
 0x337   :  { %827 = vsyncpa [#allocation6], 1 }
 0x338   :  { %828 = vsyncpa [#allocation4], 1 }

</bundles_post_ra>
